<compile_context>
chip_gen: v7x
topology: tpu7x:2x2x1
jax: 0.10.0
libtpu: 0.0.40
codegen_flags: <defaults>
</compile_context>

<pallas_src>
import numpy as np
import jax
import jax.numpy as jnp
from jax.experimental import pallas as pl
from jax.experimental.pallas import tpu as pltpu


def _pos_mod(a, n):
    """Non-negative remainder of a traced int32 scalar `a` modulo python int `n`."""
    n = jnp.int32(n)
    return jax.lax.rem(jax.lax.rem(a, n) + n, n)


def _displace_kernel(off_ref, x_ref, o_ref):
    # off_ref : SMEM int32 (num_groups, 2) -- (dy, dx) per channel group
    # o_ref / x_ref : VMEM (n_blk, cpg, H, W) -- current (group, batch-block) tile
    g = pl.program_id(0)
    dy = off_ref[g, 0]
    dx = off_ref[g, 1]
    n_blk, cpg, H, W = x_ref.shape

    # Collapse the leading (batch, channel) dims; the last two (tiled) dims are
    # untouched so this reshape is free.
    x = x_ref[...].reshape(n_blk * cpg, H, W)

    # Circular shift on the XLU, then zero the wrapped region on the VPU:
    #   out[y, x] = in[y - dy, x - dx]  iff both source indices are in range.
    shifted = pltpu.roll(x, _pos_mod(dy, H), axis=1)
    shifted = pltpu.roll(shifted, _pos_mod(dx, W), axis=2)

    row = jax.lax.broadcasted_iota(jnp.int32, (H, W), 0)
    col = jax.lax.broadcasted_iota(jnp.int32, (H, W), 1)
    valid = (row >= dy) & (row < H + dy) & (col >= dx) & (col < W + dx)

    out = jnp.where(valid[None], shifted, 0.0).astype(o_ref.dtype)
    o_ref[...] = out.reshape(o_ref.shape)   # one lane-dense whole-tile store


def displace(x, offsets, channels_per_group, *, max_tile_bytes=4 * 1024 * 1024):
    """Pallas TPU forward of the Displace autograd Function (NCHW layout)."""
    N, C, H, W = x.shape
    G = offsets.shape[0]
    cpg = channels_per_group
    assert C == G * cpg

    # Batch-block size: largest divisor of N whose slab stays under the budget
    # (x2 arrays x2 pipeline buffers ~= 4x this -> comfortably inside v7x's
    # 64 MiB VMEM and v5e/v6e's 128 MiB).
    slab_bytes = cpg * H * W * jnp.dtype(x.dtype).itemsize
    n_blk = 1
    for d in range(1, N + 1):
        if N % d == 0 and d * slab_bytes <= max_tile_bytes:
            n_blk = d

    tile_spec = pl.BlockSpec(
        (n_blk, cpg, H, W),
        lambda g, n, off: (n, g, 0, 0),   # prefetch ref passed positionally
    )
    return pl.pallas_call(
        _displace_kernel,
        out_shape=jax.ShapeDtypeStruct((N, C, H, W), x.dtype),
        grid_spec=pltpu.PrefetchScalarGridSpec(
            num_scalar_prefetch=1,          # offsets -> SMEM
            grid=(G, N // n_blk),
            in_specs=[tile_spec],
            out_specs=tile_spec,
        ),
        compiler_params=pltpu.CompilerParams(
            dimension_semantics=("parallel", "parallel")),
    )(offsets.astype(jnp.int32), x)


class Model:
    """JAX analogue of _Model: wraps a function and applies it in forward."""

    def __init__(self, fn):
        self.fn = fn

    def __call__(self, *args):
        return self.fn(*args)


def displace_ref_np(x, offsets, cpg):
    """Pure-numpy reference of the Displace forward."""
    x = np.asarray(x)
    offsets = np.asarray(offsets)
    N, C, H, W = x.shape
    out = np.zeros_like(x)
    for g in range(offsets.shape[0]):
        dy, dx = int(offsets[g, 0]), int(offsets[g, 1])
        src = x[:, g * cpg:(g + 1) * cpg]
        padded = np.pad(src, ((0, 0), (0, 0), (H, H), (W, W)))
        out[:, g * cpg:(g + 1) * cpg] = padded[
            :, :, H - dy:2 * H - dy, W - dx:2 * W - dx]
    return out


if __name__ == "__main__":
    key = jax.random.PRNGKey(0)
    N, C, H, W = 2, 8, 16, 128          # small, lane-aligned spatial width
    num_offsets = 4
    cpg = C // num_offsets

    x = jax.random.normal(key, (N, C, H, W), dtype=jnp.float32)
    offsets = jnp.array([[1, 3], [-2, 7], [0, -5], [6, 0]], dtype=jnp.int32)

    model = Model(lambda a, o: displace(a, o, cpg))
    out = jax.block_until_ready(model(x, offsets))

    ref = displace_ref_np(x, offsets, cpg)
    np.testing.assert_allclose(np.asarray(out), ref, atol=1e-6, rtol=0)
    print("KERNEL_OK")
</pallas_src>

<mosaic_0001>
module attributes {stable_mosaic.version = 11 : i64} {
  func.func @_displace_kernel(%arg0: i32, %arg1: i32, %arg2: memref<4x2xi32, #tpu.memory_space<smem>>, %arg3: memref<2x2x16x128xf32, #tpu.memory_space<vmem>>, %arg4: memref<2x2x16x128xf32, #tpu.memory_space<vmem>>) attributes {dimension_semantics = [#tpu.dimension_semantics<parallel>, #tpu.dimension_semantics<parallel>], iteration_bounds = array<i64: 4, 1>, scalar_prefetch = 1 : i64, scratch_operands = 0 : i64, tpu.core_type = #tpu.core_type<tc>, window_params = [{transform_indices = @transform_0, window_bounds = array<i64: 2, 2, 16, 128>}, {transform_indices = @transform_1, window_bounds = array<i64: 2, 2, 16, 128>}]} {
    %0 = arith.index_cast %arg0 : i32 to index
    %c0 = arith.constant 0 : index
    %1 = memref.load %arg2[%0, %c0] : memref<4x2xi32, #tpu.memory_space<smem>>
    %2 = arith.index_cast %arg0 : i32 to index
    %c1 = arith.constant 1 : index
    %3 = memref.load %arg2[%2, %c1] : memref<4x2xi32, #tpu.memory_space<smem>>
    %c0_0 = arith.constant 0 : index
    %c0_1 = arith.constant 0 : index
    %c0_2 = arith.constant 0 : index
    %c0_3 = arith.constant 0 : index
    %4 = vector.load %arg3[%c0_0, %c0_1, %c0_2, %c0_3] : memref<2x2x16x128xf32, #tpu.memory_space<vmem>>, vector<2x2x16x128xf32>
    %5 = vector.shape_cast %4 : vector<2x2x16x128xf32> to vector<4x16x128xf32>
    %c16_i32 = arith.constant 16 : i32
    %6 = arith.remsi %1, %c16_i32 : i32
    %c16_i32_4 = arith.constant 16 : i32
    %7 = arith.addi %6, %c16_i32_4 : i32
    %c16_i32_5 = arith.constant 16 : i32
    %8 = arith.remsi %7, %c16_i32_5 : i32
    %9 = tpu.dynamic_rotate %5 by %8 dim 1 : vector<4x16x128xf32>, i32 -> vector<4x16x128xf32>
    %c128_i32 = arith.constant 128 : i32
    %10 = arith.remsi %3, %c128_i32 : i32
    %c128_i32_6 = arith.constant 128 : i32
    %11 = arith.addi %10, %c128_i32_6 : i32
    %c128_i32_7 = arith.constant 128 : i32
    %12 = arith.remsi %11, %c128_i32_7 : i32
    %13 = tpu.dynamic_rotate %9 by %12 dim 2 : vector<4x16x128xf32>, i32 -> vector<4x16x128xf32>
    %14 = tpu.iota {dimensions = array<i32: 0>} : vector<16x128xi32>
    %15 = tpu.iota {dimensions = array<i32: 1>} : vector<16x128xi32>
    %16 = vector.broadcast %1 : i32 to vector<16x128xi32>
    %17 = arith.cmpi sge, %14, %16 : vector<16x128xi32>
    %c16_i32_8 = arith.constant 16 : i32
    %18 = arith.addi %c16_i32_8, %1 : i32
    %19 = vector.broadcast %18 : i32 to vector<16x128xi32>
    %20 = arith.cmpi slt, %14, %19 : vector<16x128xi32>
    %21 = arith.andi %17, %20 : vector<16x128xi1>
    %22 = vector.broadcast %3 : i32 to vector<16x128xi32>
    %23 = arith.cmpi sge, %15, %22 : vector<16x128xi32>
    %24 = arith.andi %21, %23 : vector<16x128xi1>
    %c128_i32_9 = arith.constant 128 : i32
    %25 = arith.addi %c128_i32_9, %3 : i32
    %26 = vector.broadcast %25 : i32 to vector<16x128xi32>
    %27 = arith.cmpi slt, %15, %26 : vector<16x128xi32>
    %28 = arith.andi %24, %27 : vector<16x128xi1>
    %29 = vector.shape_cast %28 : vector<16x128xi1> to vector<1x16x128xi1>
    %cst = arith.constant 0.000000e+00 : f32
    %30 = vector.shape_cast %29 : vector<1x16x128xi1> to vector<1x16x128xi1>
    %31 = vector.broadcast %30 : vector<1x16x128xi1> to vector<4x16x128xi1>
    %32 = vector.broadcast %cst : f32 to vector<4x16x128xf32>
    %33 = arith.select %31, %13, %32 : vector<4x16x128xi1>, vector<4x16x128xf32>
    %34 = vector.shape_cast %33 : vector<4x16x128xf32> to vector<2x2x16x128xf32>
    %c0_10 = arith.constant 0 : index
    %c0_11 = arith.constant 0 : index
    %c0_12 = arith.constant 0 : index
    %c0_13 = arith.constant 0 : index
    %35 = vector.load %arg4[%c0_10, %c0_11, %c0_12, %c0_13] : memref<2x2x16x128xf32, #tpu.memory_space<vmem>>, vector<2x2x16x128xf32>
    tpu.vector_store %arg4[%c0_10, %c0_11, %c0_12, %c0_13], %34 {strides = array<i32>} : memref<2x2x16x128xf32, #tpu.memory_space<vmem>>, vector<2x2x16x128xf32>,
    return
  }
  func.func @transform_0(%arg0: i32, %arg1: i32, %arg2: memref<4x2xi32, #tpu.memory_space<smem>>) -> (i32, i32, i32, i32) {
    %c0_i32 = arith.constant 0 : i32
    %c0_i32_0 = arith.constant 0 : i32
    %c0_i32_1 = arith.constant 0 : i32
    return %arg1, %arg0, %c0_i32, %c0_i32_0 : i32, i32, i32, i32
  }
  func.func @transform_1(%arg0: i32, %arg1: i32, %arg2: memref<4x2xi32, #tpu.memory_space<smem>>) -> (i32, i32, i32, i32) {
    %c0_i32 = arith.constant 0 : i32
    %c0_i32_0 = arith.constant 0 : i32
    %c0_i32_1 = arith.constant 0 : i32
    return %arg1, %arg0, %c0_i32, %c0_i32_0 : i32, i32, i32, i32
  }
}

</mosaic_0001>

<bundles_post_ra>
// kernel: tpu_custom_call.1
= control target key start
LH: loop header
LB: loop body
LE: loop exit
PB: predicated region body
PF: predicated region fallthrough
CT: control target
= control target key end

     0   :  { %s910_s0 = inlined_call_operand.vmem [shape: s32[4,2], index: 0, kind: input, shape index: {}]   ;;  %s911_s1 = inlined_call_operand.hbm [shape: f32[2,8,16,128], index: 1, kind: input, shape index: {}]   ;;  %s912_s2 = inlined_call_operand.hbm [shape: f32[2,8,16,128], index: 2, kind: output, shape index: {}]  }
   0x1   :  { %s7_s11 = sshll.u32 %s910_s0, 4  ;;  %s8_s11 = int_to_ptr.vmem [resolvable:$true] %s7_s11 }
   0x2   :  { %s577_s12 = scalar_lea.vmem %s8_s11, 64  ;;  %p582_p1 = scmp.lt.s32.totalorder %s8_s11, %s8_s11 }
   0x3   :  { %p578_p0 = scmp.ne.s32.totalorder %s8_s11, %s577_s12  ;;  %p583_p2 = scmp.lt.s32.totalorder %s577_s12, %s577_s12 }
   0x5   :  { %p584_p3 = por %p583_p2, %p582_p1 }
   0x7   :  { %p585_p4 = pnand %p584_p3, %p578_p0 }
   0x9   :  { %588 = shalt.err (!%p585_p4)  }
   0xa   :  { %s647_s13 = smov [#allocation3]  }
   0xb   :  { %10 = dma.vmem_to_smem %s8_s11, 64, %s647_s13, [#allocation2] }
   0xc   :  { %613 = dma.done.wait [#allocation2], 64 }
   0xd   :  { %614 = vsyncadd [#allocation2], 4294967232 }
   0xe   :  { %12 = sfence }
   0xf   :  { %13 = vsyncpa [#allocation5], 0 }
  0x10   :  { %15 = vsyncpa [#allocation5 + $0x1], 0 }
  0x11   :  { %16 = vsyncpa [#allocation6], 0 }
  0x12   :  { %18 = vsyncpa [#allocation6 + $0x1], 0  ;;  %s679_s14 = smov 0   ;;  %s681_s0 = smov 0  }
  0x13   :  { %s683_s15 = smov 0   ;;  %s685_s16 = smov 0  }
  0x14   :  { %s687_s17 = smov 0   ;;  %s689_s18 = smov 0  }
  0x15 LB: > { %s465_s19 = sadd.s32 4294967295, %s645_s18   ;;  %s466_s20 = sadd.s32 4294967294, %s645_s18   ;;  %s645_s18 = sphi %s689_s18, %s24_s18   ;;  %s641_s17 = sphi %s687_s17, %s931_s17   ;;  %s637_s16 = sphi %s685_s16, %s930_s16   ;;  %s633_s15 = sphi %s683_s15, %s929_s15   ;;  %s629_s0 = sphi %s681_s0, %s928_s0   ;;  %s625_s14 = sphi %s679_s14, %s927_s14  }
  0x16   : > { %s36_s21 = sadd.s32 1, %s641_s17  ;;  %s45_s22 = sadd.s32 1, %s633_s15 }
  0x17   : > { %p38_p5 = scmp.ge.s32.totalorder %s36_s21, 4  ;;  %p52_p6 = scmp.ne.s32.totalorder %s633_s15, %s629_s0 }
  0x18   : > { %p53_p7 = scmp.eq.s32.totalorder %s645_s18, 0  ;;  %p58_p8 = scmp.ne.s32.totalorder %s629_s0, %s625_s14 }
  0x19   : > { %s933_s21 = smov (%p38_p5, %s36_s21), 0  ;;  %p59_p10 = scmp.eq.s32.totalorder %s465_s19, 0 }
  0x1a   : > { %p720_p9 = por %p53_p7, %p52_p6  ;;  %s41_s24 = ssub.s32 %s641_s17, %s933_s21 }
  0x1b   : > { %p84_p11 = scmp.eq.s32.totalorder %s465_s19, 3  ;;  %p43_p12 = scmp.eq.s32.totalorder %s41_s24, 0 }
  0x1c   : > { %p726_p13 = por %p59_p10, %p58_p8  ;;  %p90_p1 = scmp.eq.s32.totalorder %s466_s20, 3 }
  0x1d   : > { %p730_p0 = por %p84_p11, %p52_p6  ;;  %p468_p3 = scmp.ge.s32.totalorder %s645_s18, 4 }
  0x1e   : > { %s735_s27 = scalar_select %p43_p12, %s633_s15, %s45_s22  }
  0x1f   : > { %p737_p2 = por %p90_p1, %p58_p8  ;;  %106 = sbr.rel (%p468_p3) target bundleno = 51 (0x33), region = 16 }
  0x26   : > { %s110_s29 = sand.u32 1, %s633_s15   ;;  %s490_s30 = sshll.u32 %s641_s17, 9 }
  0x27   : > { %s469_s3 = sshll.u32 %s110_s29, 6  ;;  %s124_s6 = scalar_lea.hbm %s911_s1, %s490_s30 }
  0x28   : > { %s493_s7 = scalar_select %p720_p9, [#allocation0], [#allocation12] }
  0x29   : > { %s114_s8 = scalar_lea.vmem [#allocation4], %s469_s3  ;;  %s648_s11 = smov 2048  }
  0x2a   : > { %s137_s9 = sshll.u32 %s114_s8, 4  ;;  %s129_s10 = sld [smem:[%s493_s7]]   ;;  %s138_s9 = int_to_ptr.vmem [resolvable:$true] %s137_s9 }
  0x2b   : > { %494 = sst [smem:[#allocation9]] (%p720_p9), %s648_s11  ;;  %s649_s12 = smov 512  }
  0x2c   : > { %495 = sst [smem:[#allocation9 + $0x1]] (%p720_p9), %s649_s12  ;;  %s650_s13 = smov 4  }
  0x2d   : > { %496 = sst [smem:[#allocation9 + $0x2]] (%p720_p9), %s650_s13  ;;  %s651_s19 = smov 128  }
  0x2e   : > { %497 = sst [smem:[#allocation9 + $0x3]] (%p720_p9), %s651_s19  ;;  %s652_s22 = smov 8  }
  0x2f   : > { %498 = sst [smem:[#allocation9 + $0x4]] (%p720_p9), %s651_s19  ;;  %s111_s30 = scalar_lea.sflag [#allocation5], %s110_s29 }
  0x30   : > { %s473_s20 = sshll.u32 %s129_s10, 26  ;;  %499 = sst [smem:[#allocation9 + $0x5]] (%p720_p9), %s652_s22 }
  0x31   : > { %s474_s24 = sadd.s32 134217728, %s473_s20  ;;  %s653_s3 = smov [#allocation8]  }
  0x32   : > { %500 = dma.general (%p720_p9), %s124_s6, 1024, %s138_s9, %s111_s30, %s653_s3, [#allocation9], %s474_s24, 0  }
  0x33 PF: > { %p475_p4 = scmp.ge.s32.totalorder %s645_s18, 1  ;;  %p158_p5 = scmp.lt.s32.totalorder %s645_s18, 5 }
  0x35   : > { %p159_p6 = pnand %p475_p4, %p158_p5 }
  0x36   : > { %s766_s4 = sand.u32 (!%p159_p6), 1, %s629_s0  }
  0x37   : > { %162 = sbr.rel (%p159_p6) target bundleno = 225 (0xe1), region = 24  ;;  %s476_s5 = sshll.u32 (!%p159_p6), %s766_s4, 6 }
  0x38   : > { %s165_s7 = scalar_lea.sflag (!%p159_p6), [#allocation5], %s766_s4  ;;  %s772_s29 = scalar_lea.vmem (!%p159_p6), [#allocation4], %s476_s5 }
  0x3e   : > { %616 = dma.done.wait (%p726_p13), %s165_s7, 1024  }
  0x3f   : > { %618 = vsyncadd (%p726_p13), %s165_s7, 4294966272  ;;  %s478_s23 = sshll.u32 %s637_s16, 7  ;;  %v237_v0 = vlaneseq  ;;  %v197_v11 = vld [vmem:[%s772_s29 + $0x10] sm:$0xff]  ;;  %v198_v12 = vld [vmem:[%s772_s29 + $0x18] sm:$0xff] }
  0x40   : > { %s779_s6 = sld [smem:[#allocation3 + %s478_s23]]  ;;  %s193_s8 = sadd.s32 1, %s478_s23  ;;  %v195_v13 = vld [vmem:[%s772_s29] sm:$0xff]  ;;  %v196_v16 = vld [vmem:[%s772_s29 + $0x8] sm:$0xff]  ;;  %v201_v34 = vld [vmem:[%s772_s29 + $0x30] sm:$0xff] }
  0x41   : > { %s781_s9 = sld [smem:[#allocation3 + %s193_s8]]  ;;  %v292_v1 = vand.u32 127, %v237_v0  ;;  %v238_v2 = vshrl.u32 %v237_v0, 7  ;;  %v199_v26 = vld [vmem:[%s772_s29 + $0x20] sm:$0xff]  ;;  %v200_v27 = vld [vmem:[%s772_s29 + $0x28] sm:$0xff]  ;;  %v202_v35 = vld [vmem:[%s772_s29 + $0x38] sm:$0xff] }
  0x42   : > { %s186_s29 = scalar_lea.vmem [#allocation7], %s476_s5  ;;  %s332_s5 = scalar_lea.sflag [#allocation6], %s766_s4 }
  0x43   : > { %v290_v9 = vadd.s32 8, %v238_v2 }
  0x46   : > { %p203_p7 = scmp.lt.s32.totalorder %s779_s6, 0  ;;  %s204_s25 = ssub.s32 0, %s779_s6  ;;  %v293_v3 = vstv %s779_s6 }
  0x47   : > { %s479_s10 = smin.u32 %s204_s25, %s779_s6  ;;  %vm787_vm0 = vcmp.ge.s32.totalorder %v238_v2, %v293_v3  ;;  %v302_v5 = vstv %s781_s9  ;;  %s260_s12 = ssub.s32 0, %s781_s9  ;;  %vm295_vm7 = vcmp.ge.s32.totalorder %v290_v9, %v293_v3 }
  0x48   : > { %s206_s11 = sand.u32 15, %s479_s10   ;;  %vm793_vm1 = vcmp.ge.s32.totalorder %v292_v1, %v302_v5  ;;  %s481_s19 = smin.u32 %s260_s12, %s781_s9 }
  0x49   : > { %s207_s13 = ssub.s32 0, %s206_s11  ;;  %s296_s20 = sadd.s32 16, %s779_s6 }
  0x4a   : > { %s935_s13 = smov (!%p203_p7, %s207_s13), %s206_s11  ;;  %s262_s24 = sand.u32 127, %s481_s19   ;;  %v297_v7 = vstv %s296_s20 }
  0x4b   : > { %s209_s22 = sadd.s32 16, %s935_s13  ;;  %vm298_vm2 = vcmp.lt.s32.totalorder %v238_v2, %v297_v7  ;;  %s306_s3 = sadd.s32 128, %s781_s9  ;;  %vm299_vm8 = vcmp.lt.s32.totalorder %v290_v9, %v297_v7 }
  0x4c   : > { %s211_s30 = ssub.s32 0, %s209_s22  ;;  %p259_p8 = scmp.lt.s32.totalorder %s781_s9, 0  ;;  %vm300_vm3 = vmand %vm787_vm0, %vm298_vm2  ;;  %v307_v8 = vstv %s306_s3 }
  0x4d   : > { %s480_s7 = smin.u32 %s211_s30, %s209_s22  ;;  %s263_s8 = ssub.s32 0, %s262_s24  ;;  %vm304_vm4 = vmand %vm300_vm3, %vm793_vm1  ;;  %vm308_vm5 = vcmp.lt.s32.totalorder %v292_v1, %v307_v8 }
  0x4e   : > { %s213_s23 = sand.u32 15, %s480_s7   ;;  %vm805_vm6 = vmand %vm304_vm4, %vm308_vm5  ;;  %s937_s8 = smov (!%p259_p8, %s263_s8), %s262_s24 }
  0x4f   : > { %vm301_vm9 = vmand %vm295_vm7, %vm299_vm8  ;;  %s217_s6 = sand.u32 7, %s213_s23   ;;  %s218_s9 = sshrl.u32 %s213_s23, 3 }
  0x50   : > { %vm305_vm10 = vmand %vm301_vm9, %vm793_vm1  ;;  %s219_s25 = ssub.s32 8, %s217_s6  ;;  %v236_v15 = vstv %s217_s6  ;;  %s248_s10 = sand.u32 1, %s218_s9 }
  0x51   : > { %vm814_vm11 = vmand %vm305_vm10, %vm308_vm5  ;;  %v220_v17 = vstv %s219_s25  ;;  %vm819_vm12 = vcmp.lt.s32.totalorder %v238_v2, %v236_v15  ;;  %v249_v19 = vstv %s248_s10  ;;  %s265_s11 = sadd.s32 128, %s937_s8 }
  0x52   : > { %v223_v20 = vrot.slane %v197_v11, %v220_v17  ;;  %v231_v21 = vrot.slane %v198_v12, %v220_v17  ;;  %s267_s12 = ssub.s32 0, %s265_s11  ;;  %v221_v22 = vrot.slane %v195_v13, %v220_v17  ;;  %vm250_vm13 = vcmp.ne.s32.totalorder %v249_v19, 0 }
  0x53   : > { %s482_s13 = smin.u32 %s267_s12, %s265_s11  ;;  %v229_v23 = vrot.slane %v196_v16, %v220_v17  ;;  %v225_v32 = vrot.slane %v199_v26, %v220_v17  ;;  %v233_v33 = vrot.slane %v200_v27, %v220_v17  ;;  %v227_v40 = vrot.slane %v201_v34, %v220_v17 }
  0x54   : > { %v241_v24 = vsel %vm819_vm12, %v223_v20, %v231_v21  ;;  %v245_v25 = vsel %vm819_vm12, %v231_v21, %v223_v20  ;;  %s269_s19 = sand.u32 127, %s482_s13   ;;  %v235_v41 = vrot.slane %v202_v35, %v220_v17 }
  0x55   : > { %v240_v28 = vsel %vm819_vm12, %v221_v22, %v229_v23  ;;  %v244_v29 = vsel %vm819_vm12, %v229_v23, %v221_v22  ;;  %v253_v30 = vsel %vm250_vm13, %v241_v24, %v245_v25  ;;  %v254_v36 = vsel %vm250_vm13, %v245_v25, %v241_v24 }
  0x56   : > { %v251_v31 = vsel %vm250_vm13, %v240_v28, %v244_v29  ;;  %278 = vrot.lane.b32.xlu1 %v253_v30, %s269_s19  ;;  %v252_v37 = vsel %vm250_vm13, %v244_v29, %v240_v28  ;;  %v242_v38 = vsel %vm819_vm12, %v225_v32, %v233_v33  ;;  %v246_v39 = vsel %vm819_vm12, %v233_v33, %v225_v32 }
  0x57   : > { %274 = vrot.lane.b32.xlu0 %v251_v31, %s269_s19  ;;  %v256_v42 = vsel %vm250_vm13, %v246_v39, %v242_v38  ;;  %v255_v43 = vsel %vm250_vm13, %v242_v38, %v246_v39  ;;  %v243_v44 = vsel %vm819_vm12, %v227_v40, %v235_v41  ;;  %v247_v45 = vsel %vm819_vm12, %v235_v41, %v227_v40 }
  0x58   : > { %v258_v46 = vsel %vm250_vm13, %v247_v45, %v243_v44  ;;  %v257_v47 = vsel %vm250_vm13, %v243_v44, %v247_v45 }
  0x5a   : > { %280 = vrot.lane.b32.xlu1 %v254_v36, %s269_s19 }
  0x5b   : > { %276 = vrot.lane.b32.xlu0 %v252_v37, %s269_s19 }
  0x5e   : > { %284 = vrot.lane.b32.xlu1 %v256_v42, %s269_s19 }
  0x5f   : > { %282 = vrot.lane.b32.xlu0 %v255_v43, %s269_s19 }
  0x62   : > { %288 = vrot.lane.b32.xlu1 %v258_v46, %s269_s19 }
  0x63   : > { %286 = vrot.lane.b32.xlu0 %v257_v47, %s269_s19 }
  0xc8   : > { %v279_v48 = vpop.permute.xlu1 %278 }
  0xc9   : > { %v275_v49 = vpop.permute.xlu0 %274  ;;  %v317_v50 = vsel %vm805_vm6, %v279_v48, 0.0 }
  0xca   : > { %v315_v51 = vsel %vm805_vm6, %v275_v49, 0.0  ;;  %325 = vst [vmem:[%s186_s29 + $0x10] sm:$0xff] %v317_v50 }
  0xcb   : > { %323 = vst [vmem:[%s186_s29] sm:$0xff] %v315_v51 }
  0xcc   : > { %v281_v52 = vpop.permute.xlu1 %280 }
  0xcd   : > { %v277_v53 = vpop.permute.xlu0 %276  ;;  %v318_v54 = vsel %vm814_vm11, %v281_v52, 0.0 }
  0xce   : > { %v316_v55 = vsel %vm814_vm11, %v277_v53, 0.0  ;;  %326 = vst [vmem:[%s186_s29 + $0x18] sm:$0xff] %v318_v54 }
  0xcf   : > { %324 = vst [vmem:[%s186_s29 + $0x8] sm:$0xff] %v316_v55 }
  0xd0   : > { %v285_v56 = vpop.permute.xlu1 %284 }
  0xd1   : > { %v283_v57 = vpop.permute.xlu0 %282  ;;  %v320_v58 = vsel %vm814_vm11, %v285_v56, 0.0 }
  0xd2   : > { %v319_v59 = vsel %vm805_vm6, %v283_v57, 0.0  ;;  %328 = vst [vmem:[%s186_s29 + $0x28] sm:$0xff] %v320_v58 }
  0xd3   : > { %327 = vst [vmem:[%s186_s29 + $0x20] sm:$0xff] %v319_v59 }
  0xd4   : > { %v289_v60 = vpop.permute.xlu1 %288 }
  0xd5   : > { %v287_v61 = vpop.permute.xlu0 %286  ;;  %v322_v62 = vsel %vm814_vm11, %v289_v60, 0.0 }
  0xd6   : > { %v321_v63 = vsel %vm805_vm6, %v287_v61, 0.0  ;;  %330 = vst [vmem:[%s186_s29 + $0x38] sm:$0xff] %v322_v62 }
  0xd7   : > { %329 = vst [vmem:[%s186_s29 + $0x30] sm:$0xff] %v321_v63 }
  0xd8   : > { %s492_s20 = sshll.u32 %s637_s16, 9  ;;  %s365_s22 = sshll.u32 %s186_s29, 4  ;;  %s366_s22 = int_to_ptr.vmem [resolvable:$true] %s365_s22 }
  0xd9   : > { %s348_s3 = scalar_lea.hbm %s912_s2, %s492_s20  ;;  %s654_s7 = smov 512  }
  0xda   : > { %502 = sst [smem:[#allocation11]] (%p730_p0), %s654_s7  ;;  %s655_s23 = smov 2048  }
  0xdb   : > { %503 = sst [smem:[#allocation11 + $0x1]] (%p730_p0), %s655_s23  ;;  %s656_s4 = smov 4  }
  0xdc   : > { %504 = sst [smem:[#allocation11 + $0x2]] (%p730_p0), %s656_s4  ;;  %s657_s8 = smov 128  }
  0xdd   : > { %505 = sst [smem:[#allocation11 + $0x3]] (%p730_p0), %s657_s8  ;;  %s658_s16 = smov 8  }
  0xde   : > { %506 = sst [smem:[#allocation11 + $0x4]] (%p730_p0), %s657_s8  ;;  %s659_s6 = smov [#allocation10]  }
  0xdf   : > { %507 = sst [smem:[#allocation11 + $0x5]] (%p730_p0), %s658_s16  ;;  %s660_s9 = smov 0  }
  0xe0   : > { %508 = dma.general (%p730_p0), %s366_s22, 1024, %s348_s3, %s332_s5, %s659_s6, [#allocation11], %s660_s9, 0  }
  0xe1 PF: > { %p514_p9 = scmp.ge.s32.totalorder %s645_s18, 2  ;;  %s393_s25 = sand.u32 1, %s625_s14  }
  0xe2   : > { %s394_s10 = scalar_lea.sflag [#allocation6], %s393_s25 }
  0xe3   : > { %p511_p10 = pnand %p514_p9, %p737_p2 }
  0xe5   : > { %620 = dma.done.wait (!%p511_p10), %s394_s10, 1024  }
  0xe6   : > { %622 = vsyncadd (!%p511_p10), %s394_s10, 4294966272  ;;  %s24_s18 = sadd.s32 1, %s645_s18   ;;  %s927_s14 = smov %s629_s0 }
  0xe7   : > { %p21_p11 = scmp.ge.s32.totalorder %s24_s18, 6   ;;  %s928_s0 = smov %s633_s15 }
  0xe8   : > { %s929_s15 = smov %s735_s27  ;;  %s930_s16 = smov %s641_s17 }
  0xe9   : > { %s931_s17 = smov %s933_s21  ;;  %23 = sbr.rel (!%p21_p11) target bundleno = 21 (0x15), region = 79 }
  0xf0   :  { %399 = vsyncpa [#allocation5], 1 }
  0xf1   :  { %401 = vsyncpa [#allocation5 + $0x1], 1 }
  0xf2   :  { %402 = vsyncpa [#allocation6], 1 }
  0xf3   :  { %404 = vsyncpa [#allocation6 + $0x1], 1 }

</bundles_post_ra>
